<compile_context>
chip_gen: v5e
topology: v5e:2x2
jax: 0.10.0
libtpu: 0.0.40
codegen_flags: <defaults>
</compile_context>

<pallas_src>
import jax
import jax.numpy as jnp
from jax.experimental import pallas as pl
from jax.experimental.pallas import tpu as pltpu  # noqa: F401  (kept for TPU backend parity)


def learn_masked_default_kernel(x_ref, mask_ref, defaults_ref, out_ref):
    # mask_ref: (B, S) float32 containing 0/1.  A row is "valid" if ANY entry set.
    m = (jnp.max(mask_ref[...], axis=-1, keepdims=True) > 0.0).astype(jnp.float32)  # (B, 1)
    # Exactly the PyTorch arithmetic: x * m + defaults * (1 - m)
    out_ref[...] = (x_ref[...] * m + defaults_ref[...] * (1.0 - m)).astype(out_ref.dtype)


def learn_masked_default(x, mask, learned_defaults):
    """x: (B, D) f32, mask: (B, ...) bool, learned_defaults: (D,) f32 -> (B, D)."""
    B, D = x.shape
    mask2d = mask.reshape(B, -1).astype(jnp.float32)   # (B, S) 0/1 — avoids bool layouts
    S = mask2d.shape[1]
    defaults2d = learned_defaults.reshape(1, D)

    return pl.pallas_call(
        learn_masked_default_kernel,
        out_shape=jax.ShapeDtypeStruct((B, D), x.dtype),
        # grid=() : single invocation, whole arrays as full VMEM blocks.
        in_specs=[
            pl.BlockSpec((B, D), lambda: (0, 0)),   # x
            pl.BlockSpec((B, S), lambda: (0, 0)),   # mask (float 0/1)
            pl.BlockSpec((1, D), lambda: (0, 0)),   # learned defaults
        ],
        out_specs=pl.BlockSpec((B, D), lambda: (0, 0)),
    )(x, mask2d, defaults2d)


def reference(x, mask, learned_defaults):
    """Pure-JAX reference of LearnMaskedDefault.forward (eval semantics)."""
    m = jnp.any(mask.reshape(x.shape[0], -1), axis=-1).astype(jnp.float32)[:, None]
    return x * m + learned_defaults[None, :] * (1.0 - m)


if __name__ == "__main__":
    B, S, D = 2, 8, 32
    key = jax.random.PRNGKey(0)
    k_x, k_def = jax.random.split(key)

    x = jax.random.normal(k_x, (B, D), jnp.float32)
    # batch row 0: partially valid (keeps x); batch row 1: fully invalid (uses defaults)
    mask = jnp.array(
        [[True, True, False, True, False, False, False, False],
         [False, False, False, False, False, False, False, False]],
        dtype=jnp.bool_,
    )
    learned_defaults = jax.random.normal(k_def, (D,), jnp.float32)  # 'gaussian' init

    out = learn_masked_default(x, mask, learned_defaults)
    out = jax.block_until_ready(out)

    ref = reference(x, mask, learned_defaults)
    assert out.shape == (B, D)
    assert jnp.allclose(out, ref, rtol=1e-6, atol=1e-6), "mismatch vs reference"

    print("KERNEL_OK")
</pallas_src>

<mosaic_0001>
module attributes {stable_mosaic.version = 11 : i64} {
  func.func @learn_masked_default_kernel(%arg0: memref<2x32xf32, #tpu.memory_space<vmem>>, %arg1: memref<2x8xf32, #tpu.memory_space<vmem>>, %arg2: memref<1x32xf32, #tpu.memory_space<vmem>>, %arg3: memref<2x32xf32, #tpu.memory_space<vmem>>) attributes {dimension_semantics = [], scalar_prefetch = 0 : i64, scratch_operands = 0 : i64, tpu.core_type = #tpu.core_type<tc>} {
    %c0 = arith.constant 0 : index
    %c0_0 = arith.constant 0 : index
    %0 = vector.load %arg1[%c0, %c0_0] : memref<2x8xf32, #tpu.memory_space<vmem>>, vector<2x8xf32>
    %cst = arith.constant dense<0xFF800000> : vector<2xf32>
    %1 = vector.multi_reduction <maximumf>, %0, %cst [1] : vector<2x8xf32> to vector<2xf32>
    %2 = vector.shape_cast %1 : vector<2xf32> to vector<2x1xf32>
    %cst_1 = arith.constant 0.000000e+00 : f32
    %3 = vector.broadcast %cst_1 : f32 to vector<2x1xf32>
    %4 = arith.cmpf ogt, %2, %3 : vector<2x1xf32>
    %5 = arith.extui %4 : vector<2x1xi1> to vector<2x1xi32>
    %6 = arith.sitofp %5 : vector<2x1xi32> to vector<2x1xf32>
    %c0_2 = arith.constant 0 : index
    %c0_3 = arith.constant 0 : index
    %7 = vector.load %arg0[%c0_2, %c0_3] : memref<2x32xf32, #tpu.memory_space<vmem>>, vector<2x32xf32>
    %8 = vector.broadcast %6 : vector<2x1xf32> to vector<2x32xf32>
    %9 = arith.mulf %7, %8 : vector<2x32xf32>
    %c0_4 = arith.constant 0 : index
    %c0_5 = arith.constant 0 : index
    %10 = vector.load %arg2[%c0_4, %c0_5] : memref<1x32xf32, #tpu.memory_space<vmem>>, vector<1x32xf32>
    %cst_6 = arith.constant 1.000000e+00 : f32
    %11 = vector.broadcast %cst_6 : f32 to vector<2x1xf32>
    %12 = arith.subf %11, %6 : vector<2x1xf32>
    %13 = vector.broadcast %10 : vector<1x32xf32> to vector<2x32xf32>
    %14 = vector.broadcast %12 : vector<2x1xf32> to vector<2x32xf32>
    %15 = arith.mulf %13, %14 : vector<2x32xf32>
    %16 = arith.addf %9, %15 : vector<2x32xf32>
    %c0_7 = arith.constant 0 : index
    %c0_8 = arith.constant 0 : index
    %17 = vector.load %arg3[%c0_7, %c0_8] : memref<2x32xf32, #tpu.memory_space<vmem>>, vector<2x32xf32>
    tpu.vector_store %arg3[%c0_7, %c0_8], %16 {strides = array<i32>} : memref<2x32xf32, #tpu.memory_space<vmem>>, vector<2x32xf32>,
    return
  }
}

</mosaic_0001>

<bundles_post_ra>
// kernel: tpu_custom_call.1
= control target key start
LH: loop header
LB: loop body
LE: loop exit
PB: predicated region body
PF: predicated region fallthrough
CT: control target
= control target key end

     0   :  { %8 = vsyncpa [#allocation3], 0  ;;  %s200_s0 = inlined_call_operand.hbm [shape: f32[2,32], index: 0, kind: input, shape index: {}]   ;;  %s201_s1 = inlined_call_operand.hbm [shape: f32[2,8], index: 1, kind: input, shape index: {}]   ;;  %s202_s2 = inlined_call_operand.vmem [shape: f32[1,32], index: 2, kind: input, shape index: {}]   ;;  %s203_s3 = inlined_call_operand.hbm [shape: f32[2,32], index: 3, kind: output, shape index: {}]  }
   0x1   :  { %9 = vsyncpa [#allocation6], 0 }
   0x2   :  { %10 = vsyncpa [#allocation4], 0  ;;  %s16_s14 = sshll.u32 %s200_s0, 4  ;;  %s164_s15 = smov [#allocation2]   ;;  %s17_s14 = int_to_ptr.hbm [resolvable:$true] %s16_s14 }
   0x3   :  { %s18_s16 = sshll.u32 %s164_s15, 4  ;;  %s27_s19 = sshll.u32 %s201_s1, 4  ;;  %s19_s16 = int_to_ptr.vmem [resolvable:$true] %s18_s16  ;;  %s28_s19 = int_to_ptr.hbm [resolvable:$true] %s27_s19 }
   0x4   :  { %21 = dma.hbm_to_vmem [thread:$0]  %s17_s14, 32, %s19_s16, [#allocation3]  }
   0x5   :  { %s165_s20 = smov [#allocation5]  }
   0x6   :  { %s29_s21 = sshll.u32 %s165_s20, 4  ;;  %s30_s21 = int_to_ptr.vmem [resolvable:$true] %s29_s21 }
   0x7   :  { %32 = dma.hbm_to_vmem [thread:$0]  %s28_s19, 32, %s30_s21, [#allocation6]  }
   0x8   :  { %158 = dma.done.wait [#allocation3], 32  }
   0x9   :  { %159 = vsyncadd [#allocation3], 4294967264 }
   0xa   :  { %160 = dma.done.wait [#allocation6], 32  }
   0xb   :  { %161 = vsyncadd [#allocation6], 4294967264  ;;  %vm44_vm0 = vcmask 58368   ;;  %v43_v0 = vld [vmem:[#allocation5] sm:$0x3]  ;;  %v166_v4 = vmov 0.0  }
   0xc   :  { %v45_v1 = vsel %vm44_vm0, %v43_v0, -inf  ;;  %v85_v3 = vld [vmem:[%s202_s2] ss:$0 sm:$0xff]  ;;  %s167_s1 = smov [#allocation7]   ;;  %s69_s26 = sshll.u32 %s203_s3, 4  ;;  %vm60_vm2 = vcmask 254976   ;;  %s70_s26 = int_to_ptr.hbm [resolvable:$true] %s69_s26 }
   0xd   :  { %46 = vmax.xlane.f32.xlu0 %v45_v1  ;;  %v51_v6 = vld [vmem:[#allocation2] sm:$0x3]  ;;  %s67_s23 = sshll.u32 %s167_s1, 4  ;;  %s68_s23 = int_to_ptr.vmem [resolvable:$true] %s67_s23 }
  0x80   :  { %v47_v2 = vpop.xlane.xlu0 %46 }
  0x81   :  { %vm48_vm1 = vcmp.gt.f32.partialorder %v47_v2, 0.0 }
  0x82   :  { %v80_v5 = vsel %vm48_vm1, 1.0, %v166_v4 }
  0x83   :  { %v54_v7 = vsub.f32 1.0, %v80_v5  ;;  %v52_v8 = vmul.f32 %v80_v5, %v51_v6 }
  0x85   :  { %v58_v9 = vmul.f32 %v85_v3, %v54_v7 }
  0x87   :  { %v59_v10 = vadd.f32 %v58_v9, %v52_v8 }
  0x89   :  { %61 = vst.msk [vmem:[#allocation7] sm:$0x3] %vm60_vm2, %v59_v10 }
  0x8a   :  { %72 = dma.vmem_to_hbm [thread:$0]  %s68_s23, 32, %s70_s26, [#allocation4]  }
  0x8b   :  { %162 = dma.done.wait [#allocation4], 32  }
  0x8c   :  { %163 = vsyncadd [#allocation4], 4294967264 }
  0x8d   :  { %77 = vsyncpa [#allocation3], 1 }
  0x8e   :  { %78 = vsyncpa [#allocation6], 1 }
  0x8f   :  { %79 = vsyncpa [#allocation4], 1 }

</bundles_post_ra>
